<compile_context>
chip_gen: v5e
topology: v5e:2x2
jax: 0.10.0
libtpu: 0.0.40
codegen_flags: <defaults>
</compile_context>

<pallas_src>
import functools

import jax
import jax.numpy as jnp
from jax.experimental import pallas as pl
from jax.experimental.pallas import tpu as pltpu


def _cdan_loss_kernel(coeff_ref, ad_ref, p_ref, o_ref,
                      acc_sw, acc_tw, acc_swl, acc_twl,
                      *, batch_size, n_rows, tile_n, needs_row_mask):
    step = pl.program_id(0)

    @pl.when(step == 0)
    def _():
        acc_sw[...] = jnp.zeros_like(acc_sw)
        acc_tw[...] = jnp.zeros_like(acc_tw)
        acc_swl[...] = jnp.zeros_like(acc_swl)
        acc_twl[...] = jnp.zeros_like(acc_twl)

    # Global row indices covered by this tile.
    row = step * tile_n + jax.lax.broadcasted_iota(jnp.int32, (tile_n, 1), 0)

    if needs_row_mask:
        valid_b = row < n_rows                             # (tile_n, 1) bool
        valid_f = valid_b.astype(jnp.float32)
        src = jnp.where(row < batch_size, valid_f, 0.0)    # source-half mask
        tgt = valid_f - src                                # target-half mask
        # Select (not multiply) so unspecified out-of-bounds data in the edge
        # tile (possibly NaN/Inf) cannot leak into the accumulators.
        p = jnp.where(valid_b, p_ref[...], 0.0)            # (tile_n, C)
        x = jnp.where(valid_b, ad_ref[...], 0.0)           # (tile_n, 1)
    else:
        src = (row < batch_size).astype(jnp.float32)
        tgt = 1.0 - src
        p = p_ref[...]
        x = ad_ref[...]

    # EntropyLoss(reduction='none'): H_i = sum_j -p_ij * log(p_ij + 1e-5)
    ent = jnp.sum(-p * jnp.log(p + 1e-5), axis=1, keepdims=True)
    ew = 1.0 + jnp.exp(-ent)                               # entropy weight

    # BCEWithLogitsLoss(reduction='none') with dc_target = [1]*bs + [0]*(N-bs)
    # (numerically stable form, identical to PyTorch's).
    y = src
    loss = jnp.maximum(x, 0.0) - x * y + jnp.log1p(jnp.exp(-jnp.abs(x)))

    # Per-row-slot partial sums; cross-row reduce deferred to the last step.
    acc_sw[...] += ew * src
    acc_tw[...] += ew * tgt
    acc_swl[...] += ew * src * loss
    acc_twl[...] += ew * tgt * loss

    @pl.when(step == pl.num_programs(0) - 1)
    def _():
        s_src = jnp.sum(acc_sw[...], keepdims=True)        # (1, 1)
        s_tgt = jnp.sum(acc_tw[...], keepdims=True)
        num = (jnp.sum(acc_swl[...], keepdims=True) / s_src
               + jnp.sum(acc_twl[...], keepdims=True) / s_tgt)
        den = s_src / s_src + s_tgt / s_tgt                # == sum(weight)
        o_ref[...] = coeff_ref[0] * num / den


def _pick_tile_n(n_rows, n_cols):
    # ~4 MiB per (tile, C) f32 block; double-buffered that is ~8 MiB, safely
    # under the default scoped-VMEM limit on every generation while large
    # enough (>=512 rows typical) to amortise per-step pipeline overhead.
    target = max(8, (4 * 1024 * 1024) // max(1, 4 * n_cols))
    target = max(8, min(2048, (target // 8) * 8))
    if n_rows <= target:
        return n_rows          # single full-extent tile; always a legal block
    return target              # multiple of 8; edge tile handled by masking


def cdan_loss(ad_out, softmax_output, coeff=1.0):
    """CDANLoss.forward (default path) -> scalar f32."""
    ad2 = ad_out.reshape(-1, 1).astype(jnp.float32)        # ad_out.view(-1)
    p = softmax_output.astype(jnp.float32)
    n_rows, n_cls = p.shape
    batch_size = n_rows // 2
    tile_n = _pick_tile_n(n_rows, n_cls)
    grid = (pl.cdiv(n_rows, tile_n),)
    needs_row_mask = (n_rows % tile_n) != 0
    coeff_arr = jnp.asarray([coeff], dtype=jnp.float32)

    out = pl.pallas_call(
        functools.partial(_cdan_loss_kernel,
                          batch_size=batch_size, n_rows=n_rows,
                          tile_n=tile_n, needs_row_mask=needs_row_mask),
        out_shape=jax.ShapeDtypeStruct((1, 1), jnp.float32),
        grid=grid,
        in_specs=[
            pl.BlockSpec(memory_space=pltpu.MemorySpace.SMEM),    # coeff (1,)
            pl.BlockSpec((tile_n, 1), lambda i: (i, 0)),          # ad_out
            pl.BlockSpec((tile_n, n_cls), lambda i: (i, 0)),      # softmax_output
        ],
        out_specs=pl.BlockSpec((1, 1), lambda i: (0, 0)),
        scratch_shapes=[pltpu.VMEM((tile_n, 1), jnp.float32)] * 4,
        compiler_params=pltpu.CompilerParams(
            # Single grid axis carries the accumulators (reduction) -> arbitrary.
            dimension_semantics=("arbitrary",)),
    )(coeff_arr, ad2, p)
    return out[0, 0]


def _cdan_loss_ref(ad_out, softmax_output, coeff=1.0):
    """Plain-JAX reference, written exactly like the PyTorch forward."""
    n = ad_out.shape[0]
    bs = n // 2
    dc_target = jnp.concatenate(
        [jnp.ones((bs,), jnp.float32), jnp.zeros((n - bs,), jnp.float32)])
    x = ad_out.reshape(-1)
    loss = jnp.maximum(x, 0.0) - x * dc_target + jnp.log1p(jnp.exp(-jnp.abs(x)))
    entropy = jnp.sum(-softmax_output * jnp.log(softmax_output + 1e-5), axis=1)
    entropy = 1.0 + jnp.exp(-entropy)
    src_mask = dc_target
    tgt_mask = 1.0 - src_mask
    sw = entropy * src_mask
    tw = entropy * tgt_mask
    weight = sw / jnp.sum(sw) + tw / jnp.sum(tw)
    return coeff * jnp.sum(weight * loss) / jnp.sum(weight)


if __name__ == "__main__":
    # Small shapes consistent with CDAN: ad_out is the (2*bs, 1) discriminator
    # logit, softmax_output is the (2*bs, num_classes) classifier softmax.
    batch_size = 4
    N = 2 * batch_size
    num_classes = 31          # e.g. Office-31; deliberately not a lane multiple
    coeff = 1.0

    key = jax.random.PRNGKey(0)
    k1, k2 = jax.random.split(key)
    ad_out = jax.random.normal(k1, (N, 1), dtype=jnp.float32)
    logits = jax.random.normal(k2, (N, num_classes), dtype=jnp.float32)
    softmax_output = jax.nn.softmax(logits, axis=-1)

    out = cdan_loss(ad_out, softmax_output, coeff)
    jax.block_until_ready(out)

    ref = _cdan_loss_ref(ad_out, softmax_output, coeff)
    assert out.shape == ()
    assert jnp.allclose(out, ref, atol=1e-4, rtol=1e-4), (out, ref)

    print("KERNEL_OK")
</pallas_src>

<mosaic_0001>
module attributes {stable_mosaic.version = 11 : i64} {
  func.func @_cdan_loss_kernel(%arg0: i32, %arg1: memref<1xf32, #tpu.memory_space<smem>>, %arg2: memref<8x1xf32, #tpu.memory_space<vmem>>, %arg3: memref<8x31xf32, #tpu.memory_space<vmem>>, %arg4: memref<1x1xf32, #tpu.memory_space<vmem>>, %arg5: memref<8x1xf32, #tpu.memory_space<vmem>>, %arg6: memref<8x1xf32, #tpu.memory_space<vmem>>, %arg7: memref<8x1xf32, #tpu.memory_space<vmem>>, %arg8: memref<8x1xf32, #tpu.memory_space<vmem>>) attributes {dimension_semantics = [#tpu.dimension_semantics<arbitrary>], iteration_bounds = array<i64: 1>, scalar_prefetch = 0 : i64, scratch_operands = 4 : i64, tpu.core_type = #tpu.core_type<tc>, window_params = [{transform_indices = @transform_0, window_bounds = array<i64: 1>}, {transform_indices = @transform_1, window_bounds = array<i64: 8, 1>}, {transform_indices = @transform_2, window_bounds = array<i64: 8, 31>}, {pipeline_mode = #tpu.pipeline_mode<synchronous>, transform_indices = @transform_3, window_bounds = array<i64: 1, 1>}]} {
    %c0_i32 = arith.constant 0 : i32
    %0 = arith.cmpi eq, %arg0, %c0_i32 : i32
    %1 = arith.extui %0 : i1 to i32
    %c0_i32_0 = arith.constant 0 : i32
    %2 = arith.cmpi ne, %1, %c0_i32_0 : i32
    scf.if %2 {
      %cst_29 = arith.constant 0.000000e+00 : f32
      %59 = vector.broadcast %cst_29 : f32 to vector<8x1xf32>
      %c0_30 = arith.constant 0 : index
      %c0_31 = arith.constant 0 : index
      %60 = vector.load %arg5[%c0_30, %c0_31] : memref<8x1xf32, #tpu.memory_space<vmem>>, vector<8x1xf32>
      tpu.vector_store %arg5[%c0_30, %c0_31], %59 {strides = array<i32>} : memref<8x1xf32, #tpu.memory_space<vmem>>, vector<8x1xf32>,
      %cst_32 = arith.constant 0.000000e+00 : f32
      %61 = vector.broadcast %cst_32 : f32 to vector<8x1xf32>
      %c0_33 = arith.constant 0 : index
      %c0_34 = arith.constant 0 : index
      %62 = vector.load %arg6[%c0_33, %c0_34] : memref<8x1xf32, #tpu.memory_space<vmem>>, vector<8x1xf32>
      tpu.vector_store %arg6[%c0_33, %c0_34], %61 {strides = array<i32>} : memref<8x1xf32, #tpu.memory_space<vmem>>, vector<8x1xf32>,
      %cst_35 = arith.constant 0.000000e+00 : f32
      %63 = vector.broadcast %cst_35 : f32 to vector<8x1xf32>
      %c0_36 = arith.constant 0 : index
      %c0_37 = arith.constant 0 : index
      %64 = vector.load %arg7[%c0_36, %c0_37] : memref<8x1xf32, #tpu.memory_space<vmem>>, vector<8x1xf32>
      tpu.vector_store %arg7[%c0_36, %c0_37], %63 {strides = array<i32>} : memref<8x1xf32, #tpu.memory_space<vmem>>, vector<8x1xf32>,
      %cst_38 = arith.constant 0.000000e+00 : f32
      %65 = vector.broadcast %cst_38 : f32 to vector<8x1xf32>
      %c0_39 = arith.constant 0 : index
      %c0_40 = arith.constant 0 : index
      %66 = vector.load %arg8[%c0_39, %c0_40] : memref<8x1xf32, #tpu.memory_space<vmem>>, vector<8x1xf32>
      tpu.vector_store %arg8[%c0_39, %c0_40], %65 {strides = array<i32>} : memref<8x1xf32, #tpu.memory_space<vmem>>, vector<8x1xf32>,
    } else {
    }
    %c8_i32 = arith.constant 8 : i32
    %3 = arith.muli %arg0, %c8_i32 : i32
    %4 = tpu.iota {dimensions = array<i32: 0>} : vector<8x1xi32>
    %5 = vector.broadcast %3 : i32 to vector<8x1xi32>
    %6 = arith.addi %5, %4 : vector<8x1xi32>
    %c4_i32 = arith.constant 4 : i32
    %7 = vector.broadcast %c4_i32 : i32 to vector<8x1xi32>
    %8 = arith.cmpi slt, %6, %7 : vector<8x1xi32>
    %9 = arith.extui %8 : vector<8x1xi1> to vector<8x1xi32>
    %10 = arith.sitofp %9 : vector<8x1xi32> to vector<8x1xf32>
    %cst = arith.constant 1.000000e+00 : f32
    %11 = vector.broadcast %cst : f32 to vector<8x1xf32>
    %12 = arith.subf %11, %10 : vector<8x1xf32>
    %c0 = arith.constant 0 : index
    %c0_1 = arith.constant 0 : index
    %13 = vector.load %arg3[%c0, %c0_1] : memref<8x31xf32, #tpu.memory_space<vmem>>, vector<8x31xf32>
    %c0_2 = arith.constant 0 : index
    %c0_3 = arith.constant 0 : index
    %14 = vector.load %arg2[%c0_2, %c0_3] : memref<8x1xf32, #tpu.memory_space<vmem>>, vector<8x1xf32>
    %cst_4 = arith.constant 0.000000e+00 : f32
    %15 = vector.broadcast %cst_4 : f32 to vector<8x31xf32>
    %16 = arith.subf %15, %13 : vector<8x31xf32>
    %cst_5 = arith.constant 9.99999974E-6 : f32
    %17 = vector.broadcast %cst_5 : f32 to vector<8x31xf32>
    %18 = arith.addf %13, %17 : vector<8x31xf32>
    %19 = math.log %18 : vector<8x31xf32>
    %20 = arith.mulf %16, %19 : vector<8x31xf32>
    %cst_6 = arith.constant dense<0.000000e+00> : vector<8xf32>
    %21 = vector.multi_reduction <add>, %20, %cst_6 [1] : vector<8x31xf32> to vector<8xf32>
    %22 = vector.shape_cast %21 : vector<8xf32> to vector<8x1xf32>
    %cst_7 = arith.constant 0.000000e+00 : f32
    %23 = vector.broadcast %cst_7 : f32 to vector<8x1xf32>
    %24 = arith.subf %23, %22 : vector<8x1xf32>
    %25 = math.exp %24 : vector<8x1xf32>
    %cst_8 = arith.constant 1.000000e+00 : f32
    %26 = vector.broadcast %cst_8 : f32 to vector<8x1xf32>
    %27 = arith.addf %26, %25 : vector<8x1xf32>
    %cst_9 = arith.constant 0.000000e+00 : f32
    %28 = vector.broadcast %cst_9 : f32 to vector<8x1xf32>
    %29 = arith.maximumf %14, %28 : vector<8x1xf32>
    %30 = arith.mulf %14, %10 : vector<8x1xf32>
    %31 = arith.subf %29, %30 : vector<8x1xf32>
    %32 = math.absf %14 : vector<8x1xf32>
    %cst_10 = arith.constant 0.000000e+00 : f32
    %33 = vector.broadcast %cst_10 : f32 to vector<8x1xf32>
    %34 = arith.subf %33, %32 : vector<8x1xf32>
    %35 = math.exp %34 : vector<8x1xf32>
    %36 = math.log1p %35 : vector<8x1xf32>
    %37 = arith.addf %31, %36 : vector<8x1xf32>
    %c0_11 = arith.constant 0 : index
    %c0_12 = arith.constant 0 : index
    %38 = vector.load %arg5[%c0_11, %c0_12] : memref<8x1xf32, #tpu.memory_space<vmem>>, vector<8x1xf32>
    %39 = arith.mulf %27, %10 : vector<8x1xf32>
    %40 = arith.addf %38, %39 : vector<8x1xf32>
    %c0_13 = arith.constant 0 : index
    %c0_14 = arith.constant 0 : index
    %41 = vector.load %arg5[%c0_13, %c0_14] : memref<8x1xf32, #tpu.memory_space<vmem>>, vector<8x1xf32>
    tpu.vector_store %arg5[%c0_13, %c0_14], %40 {strides = array<i32>} : memref<8x1xf32, #tpu.memory_space<vmem>>, vector<8x1xf32>,
    %c0_15 = arith.constant 0 : index
    %c0_16 = arith.constant 0 : index
    %42 = vector.load %arg6[%c0_15, %c0_16] : memref<8x1xf32, #tpu.memory_space<vmem>>, vector<8x1xf32>
    %43 = arith.mulf %27, %12 : vector<8x1xf32>
    %44 = arith.addf %42, %43 : vector<8x1xf32>
    %c0_17 = arith.constant 0 : index
    %c0_18 = arith.constant 0 : index
    %45 = vector.load %arg6[%c0_17, %c0_18] : memref<8x1xf32, #tpu.memory_space<vmem>>, vector<8x1xf32>
    tpu.vector_store %arg6[%c0_17, %c0_18], %44 {strides = array<i32>} : memref<8x1xf32, #tpu.memory_space<vmem>>, vector<8x1xf32>,
    %c0_19 = arith.constant 0 : index
    %c0_20 = arith.constant 0 : index
    %46 = vector.load %arg7[%c0_19, %c0_20] : memref<8x1xf32, #tpu.memory_space<vmem>>, vector<8x1xf32>
    %47 = arith.mulf %27, %10 : vector<8x1xf32>
    %48 = arith.mulf %47, %37 : vector<8x1xf32>
    %49 = arith.addf %46, %48 : vector<8x1xf32>
    %c0_21 = arith.constant 0 : index
    %c0_22 = arith.constant 0 : index
    %50 = vector.load %arg7[%c0_21, %c0_22] : memref<8x1xf32, #tpu.memory_space<vmem>>, vector<8x1xf32>
    tpu.vector_store %arg7[%c0_21, %c0_22], %49 {strides = array<i32>} : memref<8x1xf32, #tpu.memory_space<vmem>>, vector<8x1xf32>,
    %c0_23 = arith.constant 0 : index
    %c0_24 = arith.constant 0 : index
    %51 = vector.load %arg8[%c0_23, %c0_24] : memref<8x1xf32, #tpu.memory_space<vmem>>, vector<8x1xf32>
    %52 = arith.mulf %27, %12 : vector<8x1xf32>
    %53 = arith.mulf %52, %37 : vector<8x1xf32>
    %54 = arith.addf %51, %53 : vector<8x1xf32>
    %c0_25 = arith.constant 0 : index
    %c0_26 = arith.constant 0 : index
    %55 = vector.load %arg8[%c0_25, %c0_26] : memref<8x1xf32, #tpu.memory_space<vmem>>, vector<8x1xf32>
    tpu.vector_store %arg8[%c0_25, %c0_26], %54 {strides = array<i32>} : memref<8x1xf32, #tpu.memory_space<vmem>>, vector<8x1xf32>,
    %c0_i32_27 = arith.constant 0 : i32
    %56 = arith.cmpi eq, %arg0, %c0_i32_27 : i32
    %57 = arith.extui %56 : i1 to i32
    %c0_i32_28 = arith.constant 0 : i32
    %58 = arith.cmpi ne, %57, %c0_i32_28 : i32
    scf.if %58 {
      %c0_29 = arith.constant 0 : index
      %c0_30 = arith.constant 0 : index
      %59 = vector.load %arg5[%c0_29, %c0_30] : memref<8x1xf32, #tpu.memory_space<vmem>>, vector<8x1xf32>
      %60 = vector.shape_cast %59 : vector<8x1xf32> to vector<1x8x1xf32>
      %cst_31 = arith.constant dense<0.000000e+00> : vector<1xf32>
      %61 = vector.multi_reduction <add>, %60, %cst_31 [1, 2] : vector<1x8x1xf32> to vector<1xf32>
      %62 = vector.shape_cast %61 : vector<1xf32> to vector<1x1x1xf32>
      %63 = vector.extract %62[0, 0, 0] : f32 from vector<1x1x1xf32>
      %64 = vector.broadcast %63 : f32 to vector<1x1xf32>
      %c0_32 = arith.constant 0 : index
      %c0_33 = arith.constant 0 : index
      %65 = vector.load %arg6[%c0_32, %c0_33] : memref<8x1xf32, #tpu.memory_space<vmem>>, vector<8x1xf32>
      %66 = vector.shape_cast %65 : vector<8x1xf32> to vector<1x8x1xf32>
      %cst_34 = arith.constant dense<0.000000e+00> : vector<1xf32>
      %67 = vector.multi_reduction <add>, %66, %cst_34 [1, 2] : vector<1x8x1xf32> to vector<1xf32>
      %68 = vector.shape_cast %67 : vector<1xf32> to vector<1x1x1xf32>
      %69 = vector.extract %68[0, 0, 0] : f32 from vector<1x1x1xf32>
      %70 = vector.broadcast %69 : f32 to vector<1x1xf32>
      %c0_35 = arith.constant 0 : index
      %c0_36 = arith.constant 0 : index
      %71 = vector.load %arg7[%c0_35, %c0_36] : memref<8x1xf32, #tpu.memory_space<vmem>>, vector<8x1xf32>
      %72 = vector.shape_cast %71 : vector<8x1xf32> to vector<1x8x1xf32>
      %cst_37 = arith.constant dense<0.000000e+00> : vector<1xf32>
      %73 = vector.multi_reduction <add>, %72, %cst_37 [1, 2] : vector<1x8x1xf32> to vector<1xf32>
      %74 = vector.shape_cast %73 : vector<1xf32> to vector<1x1x1xf32>
      %75 = vector.extract %74[0, 0, 0] : f32 from vector<1x1x1xf32>
      %76 = vector.broadcast %75 : f32 to vector<1x1xf32>
      %77 = arith.divf %76, %64 : vector<1x1xf32>
      %c0_38 = arith.constant 0 : index
      %c0_39 = arith.constant 0 : index
      %78 = vector.load %arg8[%c0_38, %c0_39] : memref<8x1xf32, #tpu.memory_space<vmem>>, vector<8x1xf32>
      %79 = vector.shape_cast %78 : vector<8x1xf32> to vector<1x8x1xf32>
      %cst_40 = arith.constant dense<0.000000e+00> : vector<1xf32>
      %80 = vector.multi_reduction <add>, %79, %cst_40 [1, 2] : vector<1x8x1xf32> to vector<1xf32>
      %81 = vector.shape_cast %80 : vector<1xf32> to vector<1x1x1xf32>
      %82 = vector.extract %81[0, 0, 0] : f32 from vector<1x1x1xf32>
      %83 = vector.broadcast %82 : f32 to vector<1x1xf32>
      %84 = arith.divf %83, %70 : vector<1x1xf32>
      %85 = arith.addf %77, %84 : vector<1x1xf32>
      %86 = arith.divf %64, %64 : vector<1x1xf32>
      %87 = arith.divf %70, %70 : vector<1x1xf32>
      %88 = arith.addf %86, %87 : vector<1x1xf32>
      %c0_41 = arith.constant 0 : index
      %89 = memref.load %arg1[%c0_41] : memref<1xf32, #tpu.memory_space<smem>>
      %90 = vector.broadcast %89 : f32 to vector<1x1xf32>
      %91 = arith.mulf %90, %85 : vector<1x1xf32>
      %92 = arith.divf %91, %88 : vector<1x1xf32>
      %c0_42 = arith.constant 0 : index
      %c0_43 = arith.constant 0 : index
      %93 = vector.load %arg4[%c0_42, %c0_43] : memref<1x1xf32, #tpu.memory_space<vmem>>, vector<1x1xf32>
      tpu.vector_store %arg4[%c0_42, %c0_43], %92 {strides = array<i32>} : memref<1x1xf32, #tpu.memory_space<vmem>>, vector<1x1xf32>,
    } else {
    }
    return
  }
  func.func @transform_0(%arg0: i32) -> i32 {
    %c0_i32 = arith.constant 0 : i32
    %c0_i32_0 = arith.constant 0 : i32
    return %c0_i32 : i32
  }
  func.func @transform_1(%arg0: i32) -> (i32, i32) {
    %c0_i32 = arith.constant 0 : i32
    %c0_i32_0 = arith.constant 0 : i32
    return %arg0, %c0_i32 : i32, i32
  }
  func.func @transform_2(%arg0: i32) -> (i32, i32) {
    %c0_i32 = arith.constant 0 : i32
    %c0_i32_0 = arith.constant 0 : i32
    return %arg0, %c0_i32 : i32, i32
  }
  func.func @transform_3(%arg0: i32) -> (i32, i32) {
    %c0_i32 = arith.constant 0 : i32
    %c0_i32_0 = arith.constant 0 : i32
    %c0_i32_1 = arith.constant 0 : i32
    return %c0_i32, %c0_i32_0 : i32, i32
  }
}

</mosaic_0001>

<bundles_post_ra>
// kernel: tpu_custom_call.1
= control target key start
LH: loop header
LB: loop body
LE: loop exit
PB: predicated region body
PF: predicated region fallthrough
CT: control target
= control target key end

     0   :  { %s301_s0 = inlined_call_operand.<no memory space> [shape: f32[1], index: 0, kind: input, shape index: {}]   ;;  %s302_s1 = inlined_call_operand.vmem [shape: f32[8,1], index: 1, kind: input, shape index: {}]   ;;  %s303_s2 = inlined_call_operand.vmem [shape: f32[8,31], index: 2, kind: input, shape index: {}]   ;;  %s304_s3 = inlined_call_operand.hbm [shape: f32[1,1], index: 3, kind: output, shape index: {}]  }
   0x1   :  { %v34_v0 = vld [vmem:[%s303_s2] sm:$0xff] }
   0x2   :  { %9 = vsyncpa [#allocation8], 0  ;;  %v37_v1 = vadd.f32 1e-05, %v34_v0  ;;  %v36_v2 = vsub.f32 0.0, %v34_v0  ;;  %vm41_vm0 = vcmask 252928   ;;  %v26_v13 = vlaneseq }
   0x3   :  { %v35_v7 = vld [vmem:[%s302_s1] sm:$0xff]  ;;  %vm20_vm1 = vcmask 7168   ;;  %v255_v8 = vmov 0.0   ;;  %s256_s20 = smov [#allocation7]   ;;  %s195_s24 = sshll.u32 %s304_s3, 4  ;;  %s196_s24 = int_to_ptr.hbm [resolvable:$true] %s195_s24 }
   0x4   :  { %215 = vlog2.f32 %v37_v1  ;;  %21 = vst.msk [vmem:[#allocation2] sm:$0xff] %vm20_vm1, %v255_v8  ;;  %v52_v9 = vand.u32 2147483647, %v35_v7  ;;  %v27_v15 = vshrl.u32 %v26_v13, 7  ;;  %v49_v24 = vmax.f32 %v35_v7, 0.0  ;;  %s193_s21 = sshll.u32 %s256_s20, 4  ;;  %s194_s21 = int_to_ptr.vmem [resolvable:$true] %s193_s21 }
   0x5   :  { %22 = vst.msk [vmem:[#allocation3] sm:$0xff] %vm20_vm1, %v255_v8 }
   0x6   :  { %23 = vst.msk [vmem:[#allocation4] sm:$0xff] %vm20_vm1, %v255_v8  ;;  %v53_v10 = vsub.f32 0.0, %v52_v9  ;;  %vm30_vm2 = vcmp.lt.s32.totalorder %v27_v15, 4 }
   0x7   :  { %24 = vst.msk [vmem:[#allocation5] sm:$0xff] %vm20_vm1, %v255_v8  ;;  %v204_v19 = vsel %vm30_vm2, 1.0, %v255_v8 }
   0x8   :  { %v54_v11 = vmul.f32 1.442695, %v53_v10  ;;  %v50_v25 = vmul.f32 %v204_v19, %v35_v7  ;;  %v33_v30 = vsub.f32 1.0, %v204_v19 }
   0xa   :  { %v216_v3 = vpop.eup %215  ;;  %217 = vpow2.f32 %v54_v11  ;;  %v51_v28 = vsub.f32 %v49_v24, %v50_v25 }
   0xb   :  { %v39_v4 = vmul.f32 0.6931472, %v216_v3  ;;  %v66_v34 = vld [vmem:[#allocation2] sm:$0xff] }
   0xc   :  { %v71_v35 = vld [vmem:[#allocation3] sm:$0xff] }
   0xd   :  { %v40_v5 = vmul.f32 %v39_v4, %v36_v2  ;;  %v75_v38 = vld [vmem:[#allocation4] sm:$0xff] }
   0xe   :  { %v79_v39 = vld [vmem:[#allocation5] sm:$0xff] }
   0xf   :  { %v42_v6 = vsel %vm41_vm0, %v40_v5, 0.0  ;;  %vm186_vm0 = vcmask 0  }
  0x10   :  { %43 = vadd.xlane.f32.xlu0 %v42_v6  ;;  %v218_v12 = vpop.eup %217 }
  0x11   :  { %v56_v14 = vadd.f32 1.0, %v218_v12  ;;  %v59_v16 = vmul.f32 -0.5, %v218_v12  ;;  %v62_v22 = vand.u32 2147483647, %v218_v12 }
  0x13   :  { %219 = vlog2.f32 %v56_v14  ;;  %v60_v18 = vadd.f32 1.0, %v59_v16  ;;  %vm63_vm3 = vcmp.lt.f32.partialorder %v62_v22, 0.0004427343 }
  0x15   :  { %v61_v27 = vmul.f32 %v218_v12, %v60_v18 }
  0x19   :  { %v220_v21 = vpop.eup %219 }
  0x1a   :  { %v58_v26 = vmul.f32 0.6931472, %v220_v21 }
  0x1c   :  { %v64_v29 = vsel %vm63_vm3, %v61_v27, %v58_v26 }
  0x1d   :  { %v65_v33 = vadd.f32 %v64_v29, %v51_v28 }
  0x83   :  { %v44_v17 = vpop.xlane.xlu0 %43 }
  0x84   :  { %v45_v20 = vsub.f32 0.0, %v44_v17 }
  0x86   :  { %v46_v23 = vmul.f32 1.442695, %v45_v20 }
  0x88   :  { %221 = vpow2.f32 %v46_v23 }
  0x8e   :  { %v222_v31 = vpop.eup %221 }
  0x8f   :  { %v48_v32 = vadd.f32 1.0, %v222_v31 }
  0x91   :  { %v67_v36 = vmul.f32 %v204_v19, %v48_v32  ;;  %v72_v37 = vmul.f32 %v48_v32, %v33_v30 }
  0x93   :  { %v68_v40 = vadd.f32 %v67_v36, %v66_v34  ;;  %v73_v41 = vadd.f32 %v72_v37, %v71_v35  ;;  %v76_v42 = vmul.f32 %v67_v36, %v65_v33  ;;  %v80_v43 = vmul.f32 %v72_v37, %v65_v33 }
  0x95   :  { %70 = vst.msk [vmem:[#allocation2] sm:$0xff] %vm20_vm1, %v68_v40  ;;  %v77_v44 = vadd.f32 %v76_v42, %v75_v38  ;;  %v81_v45 = vadd.f32 %v80_v43, %v79_v39 }
  0x96   :  { %74 = vst.msk [vmem:[#allocation3] sm:$0xff] %vm20_vm1, %v73_v41 }
  0x97   :  { %78 = vst.msk [vmem:[#allocation4] sm:$0xff] %vm20_vm1, %v77_v44 }
  0x98   :  { %82 = vst.msk [vmem:[#allocation5] sm:$0xff] %vm20_vm1, %v81_v45 }
  0x9c   :  { %v86_v46 = vld [vmem:[#allocation2] sm:$0xff] }
  0x9d   :  { %v98_v47 = vld [vmem:[#allocation3] sm:$0xff]  ;;  %v87_v48 = vsel %vm20_vm1, %v86_v46, 0.0 }
  0x9e   :  { %v99_v49 = vsel %vm20_vm1, %v98_v47, 0.0  ;;  %88 = vadd.xlane.f32.xlu0 %v87_v48  ;;  %v110_v52 = vld [vmem:[#allocation4] sm:$0xff] }
  0x9f   :  { %100 = vadd.xlane.f32.xlu1 %v99_v49  ;;  %v137_v50 = vld [vmem:[#allocation5] sm:$0xff]  ;;  %v111_v53 = vsel %vm20_vm1, %v110_v52, 0.0 }
  0xa0   :  { %v138_v51 = vsel %vm20_vm1, %v137_v50, 0.0 }
  0xa1   :  { %139 = vadd.xlane.f32.xlu2 %v138_v51 }
  0xa7   :  { %112 = vadd.xlane.f32.xlu1 %v111_v53 }
 0x111   :  { %v89_v54 = vpop.xlane.xlu0 %88 }
 0x112   :  { %v101_v55 = vpop.xlane.xlu1 %100  ;;  %v90_v56 = vrot.slane %v89_v54, 4 }
 0x113   :  { %v102_v57 = vrot.slane %v101_v55, 4 }
 0x114   :  { %v91_v58 = vadd.f32 %v90_v56, %v89_v54  ;;  %v140_v59 = vpop.xlane.xlu2 %139  ;;  %v169_v54 = vstv %s301_s0 }
 0x115   :  { %v103_v60 = vadd.f32 %v102_v57, %v101_v55  ;;  %v141_v61 = vrot.slane %v140_v59, 4 }
 0x116   :  { %v92_v62 = vrot.slane %v91_v58, 2 }
 0x117   :  { %v104_v63 = vrot.slane %v103_v60, 2  ;;  %v142_v0 = vadd.f32 %v141_v61, %v140_v59 }
 0x118   :  { %v93_v1 = vadd.f32 %v92_v62, %v91_v58 }
 0x119   :  { %v105_v2 = vadd.f32 %v104_v63, %v103_v60  ;;  %v143_v3 = vrot.slane %v142_v0, 2 }
 0x11a   :  { %v113_v4 = vpop.xlane.xlu1 %112  ;;  %v94_v5 = vrot.slane %v93_v1, 1 }
 0x11b   :  { %v114_v6 = vrot.slane %v113_v4, 4  ;;  %v106_v7 = vrot.slane %v105_v2, 1  ;;  %v144_v11 = vadd.f32 %v143_v3, %v142_v0 }
 0x11c   :  { %v95_v8 = vadd.f32 %v94_v5, %v93_v1 }
 0x11d   :  { %v115_v9 = vadd.f32 %v114_v6, %v113_v4  ;;  %v107_v10 = vadd.f32 %v106_v7, %v105_v2  ;;  %v145_v14 = vrot.slane %v144_v11, 1 }
 0x11e   :  { %205 = vpush %v95_v8 }
 0x11f   :  { %v116_v12 = vrot.slane %v115_v9, 2  ;;  %207 = vpush %v107_v10  ;;  %v146_v17 = vadd.f32 %v145_v14, %v144_v11 }
 0x121   :  { %v117_v13 = vadd.f32 %v116_v12, %v115_v9 }
 0x123   :  { %v118_v15 = vrot.slane %v117_v13, 1 }
 0x125   :  { %v119_v16 = vadd.f32 %v118_v15, %v117_v13 }
 0x127   :  { %209 = vpush %v119_v16 }
 0x128   :  { %211 = vpush %v146_v17 }
 0x14f   :  { %s206_s1 = spop %205 }
 0x150   :  { %v97_v18 = vstv %s206_s1  ;;  %s208_s2 = spop %207 }
 0x151   :  { %223 = vrcp.f32 %v97_v18  ;;  %v109_v19 = vstv %s208_s2  ;;  %v133_v26 = vand.u32 2147483648, %v97_v18  ;;  %v131_v28 = vand.u32 2147483647, %v97_v18 }
 0x152   :  { %225 = vrcp.f32 %v109_v19  ;;  %v160_v29 = vand.u32 2147483648, %v109_v19  ;;  %v158_v31 = vand.u32 2147483647, %v109_v19  ;;  %vm127_vm6 = vweird.f32 %v97_v18 }
 0x153   :  { %v134_v33 = vor.u32 1.1754944e-38, %v133_v26  ;;  %vm154_vm8 = vweird.f32 %v109_v19  ;;  %vm132_vm9 = vcmp.eq.f32.partialorder %v131_v28, 8.507059e+37 }
 0x154   :  { %v161_v36 = vor.u32 1.1754944e-38, %v160_v29  ;;  %vm159_vm11 = vcmp.eq.f32.partialorder %v158_v31, 8.507059e+37 }
 0x157   :  { %v224_v20 = vpop.eup %223 }
 0x158   :  { %v226_v21 = vpop.eup %225  ;;  %v123_v22 = vmul.f32 %v224_v20, %v97_v18  ;;  %vm128_vm4 = vweird.f32 %v224_v20  ;;  %s210_s16 = spop %209 }
 0x159   :  { %v150_v23 = vmul.f32 %v226_v21, %v109_v19  ;;  %vm155_vm5 = vweird.f32 %v226_v21  ;;  %vm129_vm7 = vmor %vm127_vm6, %vm128_vm4  ;;  %s212_s17 = spop %211  ;;  %v121_v44 = vstv %s210_s16 }
 0x15a   :  { %v124_v24 = vsub.f32 1.0, %v123_v22  ;;  %vm156_vm10 = vmor %vm154_vm8, %vm155_vm5  ;;  %v148_v45 = vstv %s212_s17 }
 0x15b   :  { %v151_v25 = vsub.f32 1.0, %v150_v23 }
 0x15c   :  { %v125_v27 = vmul.f32 %v224_v20, %v124_v24 }
 0x15d   :  { %v152_v30 = vmul.f32 %v226_v21, %v151_v25 }
 0x15e   :  { %v126_v32 = vadd.f32 %v224_v20, %v125_v27 }
 0x15f   :  { %v153_v34 = vadd.f32 %v226_v21, %v152_v30 }
 0x160   :  { %v130_v35 = vsel %vm129_vm7, %v224_v20, %v126_v32 }
 0x161   :  { %v135_v37 = vsel %vm132_vm9, %v134_v33, %v130_v35  ;;  %v157_v38 = vsel %vm156_vm10, %v226_v21, %v153_v34 }
 0x162   :  { %v165_v39 = vmul.f32 %v135_v37, %v97_v18  ;;  %v162_v40 = vsel %vm159_vm11, %v161_v36, %v157_v38  ;;  %v136_v46 = vmul.f32 %v135_v37, %v121_v44 }
 0x163   :  { %v166_v41 = vmul.f32 %v162_v40, %v109_v19  ;;  %v163_v47 = vmul.f32 %v162_v40, %v148_v45 }
 0x165   :  { %v167_v42 = vadd.f32 %v166_v41, %v165_v39  ;;  %v164_v51 = vadd.f32 %v163_v47, %v136_v46 }
 0x167   :  { %227 = vrcp.f32 %v167_v42  ;;  %v182_v50 = vand.u32 2147483648, %v167_v42  ;;  %v180_v53 = vand.u32 2147483647, %v167_v42  ;;  %vm176_vm13 = vweird.f32 %v167_v42 }
 0x168   :  { %v170_v57 = vmul.f32 %v169_v54, %v164_v51 }
 0x169   :  { %v183_v56 = vor.u32 1.1754944e-38, %v182_v50  ;;  %vm181_vm15 = vcmp.eq.f32.partialorder %v180_v53, 8.507059e+37 }
 0x16d   :  { %v228_v43 = vpop.eup %227 }
 0x16e   :  { %v172_v48 = vmul.f32 %v228_v43, %v167_v42  ;;  %vm177_vm12 = vweird.f32 %v228_v43 }
 0x16f   :  { %vm178_vm14 = vmor %vm176_vm13, %vm177_vm12 }
 0x170   :  { %v173_v49 = vsub.f32 1.0, %v172_v48 }
 0x172   :  { %v174_v52 = vmul.f32 %v228_v43, %v173_v49 }
 0x174   :  { %v175_v55 = vadd.f32 %v228_v43, %v174_v52 }
 0x176   :  { %v179_v58 = vsel %vm178_vm14, %v228_v43, %v175_v55 }
 0x177   :  { %v184_v59 = vsel %vm181_vm15, %v183_v56, %v179_v58 }
 0x178   :  { %v185_v60 = vmul.f32 %v184_v59, %v170_v57 }
 0x17a   :  { %187 = vst.msk [vmem:[#allocation7] sm:$0x1] %vm186_vm0, %v185_v60 }
 0x17b   :  { %198 = dma.vmem_to_hbm [thread:$0]  %s194_s21, 16, %s196_s24, [#allocation8]  }
 0x17c   :  { %253 = dma.done.wait [#allocation8], 16  }
 0x17d   :  { %254 = vsyncadd [#allocation8], 4294967280 }
 0x17e   :  { %203 = vsyncpa [#allocation8], 1 }

</bundles_post_ra>
